<compile_context>
chip_gen: v6e
topology: v6e:2x2x1
jax: 0.10.0
libtpu: 0.0.40
codegen_flags: <defaults>
</compile_context>

<pallas_src>
import functools

import jax
import jax.numpy as jnp
from jax.experimental import pallas as pl
from jax.experimental.pallas import tpu as pltpu


def _round_up(n: int, m: int) -> int:
    return ((n + m - 1) // m) * m


def _vmem_capacity_bytes() -> int:
    """Physical per-core VMEM, with a conservative fallback."""
    try:
        return int(pltpu.get_tpu_info().vmem_capacity_bytes)
    except Exception:  # older/newer jaxlib or non-TPU tracing environments
        return 128 << 20


def mlp_kernel(x_ref, w1_ref, b1_ref, w2_ref, b2_ref, o_ref):
    # fc1: operands in the weights' dtype (bf16 by default) -> full-rate MXU,
    # f32 accumulation.  Bias + ReLU run on the VPU in f32.
    x = x_ref[...].astype(w1_ref.dtype)
    h = jnp.dot(x, w1_ref[...], preferred_element_type=jnp.float32)
    h = jnp.maximum(h + b1_ref[...], 0.0)          # b1 is (1, H_p) -> row broadcast
    # fc2: stage the hidden in the MXU dtype (bf16) -- halves the live bytes
    # between the two matmuls (vreg / store-slot pressure, esp. v5e).
    h = h.astype(w2_ref.dtype)
    out = jnp.dot(h, w2_ref[...], preferred_element_type=jnp.float32)
    o_ref[...] = (out + b2_ref[...]).astype(o_ref.dtype)


def prepare_params(w1, b1, w2, b2, *, mxu_dtype=jnp.bfloat16):
    """Pad params to lane-dense shapes ONCE, outside the per-call hot path.

    w1: (D, H), b1: (H,), w2: (H, C), b2: (C,).  H and C are zero-padded to
    multiples of 128 (vreg lanes); weights are cast to `mxu_dtype` (pass
    jnp.float32 / None to keep exact f32 math); biases stay f32.
    """
    _, H = w1.shape
    C = w2.shape[1]
    H_p = _round_up(H, 128)
    C_p = _round_up(C, 128)
    w_dtype = w1.dtype if mxu_dtype is None else mxu_dtype
    w1_p = jnp.pad(w1, ((0, 0), (0, H_p - H))).astype(w_dtype)
    b1_p = jnp.pad(b1, (0, H_p - H)).astype(jnp.float32).reshape(1, H_p)
    w2_p = jnp.pad(w2, ((0, H_p - H), (0, C_p - C))).astype(w_dtype)
    b2_p = jnp.pad(b2, (0, C_p - C)).astype(jnp.float32).reshape(1, C_p)
    return w1_p, b1_p, w2_p, b2_p


@functools.partial(
    jax.jit, static_argnames=("num_classes", "tm", "single_buffer_weights"))
def _forward_padded(x, w1_p, b1_p, w2_p, b2_p, *, num_classes, tm,
                    single_buffer_weights):
    B, D = x.shape
    H_p = w1_p.shape[1]
    C_p = w2_p.shape[1]
    out_dtype = x.dtype

    # ---- batch tiling: pad B only to a sublane multiple, cdiv tail block ----
    B_p = _round_up(B, 8)
    tm_eff = min(tm, B_p)
    if B_p >= 16:
        # Guarantee >= 2 grid steps so ("parallel",) can use both v7x TCs.
        tm_eff = min(tm_eff, _round_up(pl.cdiv(B_p, 2), 8))
    grid = (pl.cdiv(B_p, tm_eff),)

    x_p = jnp.pad(x, ((0, B_p - B), (0, 0)))

    # ---- VMEM budget (bytes): pipelined activation tiles + resident weights ----
    weight_bufs = 1 if single_buffer_weights else 2
    w_bytes = (w1_p.size * w1_p.dtype.itemsize + w2_p.size * w2_p.dtype.itemsize
               + b1_p.size * b1_p.dtype.itemsize + b2_p.size * b2_p.dtype.itemsize)
    vmem_est = (2 * tm_eff * D * x_p.dtype.itemsize            # x tiles (double-buffered)
                + 2 * tm_eff * C_p * out_dtype.itemsize        # out tiles (double-buffered)
                + weight_bufs * w_bytes                        # resident W1/b1/W2/b2
                + 4 * tm_eff * H_p)                            # f32 hidden activation
    capacity = _vmem_capacity_bytes()
    # ~36 MiB cap on 64 MiB parts (v7x), up to 96 MiB on 128 MiB parts (v5e/v6e).
    hard_cap = (36 << 20) if capacity <= (64 << 20) else (96 << 20)
    vmem_limit = int(min(max(2 * vmem_est, 16 << 20), hard_cap))
    # TODO(synk): if weight_bufs * w_bytes alone exceeds hard_cap (very large
    # D/H/C), tile the H reduction of fc2 with an accumulator grid axis instead
    # of raising the limit further.

    cost = pl.CostEstimate(
        flops=2 * B_p * (D * H_p + H_p * C_p),
        transcendentals=0,
        bytes_accessed=int(x_p.size * x_p.dtype.itemsize + w_bytes
                           + B_p * C_p * out_dtype.itemsize),
    )

    # Resident weight/bias blocks: constant index map -> never re-DMA'd; ask for
    # single buffering to halve their VMEM footprint when supported.
    weight_kwargs = dict(pipeline_mode=pl.Buffered(1)) if single_buffer_weights else {}

    out_p = pl.pallas_call(
        mlp_kernel,
        out_shape=jax.ShapeDtypeStruct((B_p, C_p), out_dtype),
        grid_spec=pl.GridSpec(
            grid=grid,
            in_specs=[
                pl.BlockSpec((tm_eff, D), lambda i: (i, 0)),                  # x: moves per step
                pl.BlockSpec((D, H_p), lambda i: (0, 0), **weight_kwargs),    # W1: VMEM-resident
                pl.BlockSpec((1, H_p), lambda i: (0, 0), **weight_kwargs),    # b1: VMEM-resident
                pl.BlockSpec((H_p, C_p), lambda i: (0, 0), **weight_kwargs),  # W2: VMEM-resident
                pl.BlockSpec((1, C_p), lambda i: (0, 0), **weight_kwargs),    # b2: VMEM-resident
            ],
            out_specs=pl.BlockSpec((tm_eff, C_p), lambda i: (i, 0)),
        ),
        compiler_params=pltpu.CompilerParams(
            dimension_semantics=("parallel",),   # megacore sharding on v7x
            vmem_limit_bytes=vmem_limit,
        ),
        cost_estimate=cost,
    )(x_p, w1_p, b1_p, w2_p, b2_p)

    # Slice away zero-padded rows/cols.  Tail-block OOB rows (if grid*tm > B_p)
    # are never written back by Pallas, so only exact zero padding remains.
    return out_p[:B, :num_classes]


# Resolved on first call: does this JAX/Mosaic build accept pipeline_mode=pl.Buffered(1)?
_SINGLE_BUFFER_OK = None


def simple_net_forward(x, padded_params, num_classes, *, tm=512):
    """Forward pass of SimpleNet: relu(x @ w1 + b1) @ w2 + b2 (padded params)."""
    global _SINGLE_BUFFER_OK
    if _SINGLE_BUFFER_OK is None:
        try:
            out = _forward_padded(x, *padded_params, num_classes=num_classes,
                                  tm=tm, single_buffer_weights=True)
            jax.block_until_ready(out)
            _SINGLE_BUFFER_OK = True
            return out
        except Exception:
            _SINGLE_BUFFER_OK = False   # fall back to default double buffering
    return _forward_padded(x, *padded_params, num_classes=num_classes,
                           tm=tm, single_buffer_weights=_SINGLE_BUFFER_OK)


def init_params(key, input_size, hidden_size, num_classes, dtype=jnp.float32):
    # Deterministic init mirroring nn.Linear's U(-1/sqrt(fan_in), 1/sqrt(fan_in)).
    k1, k2, k3, k4 = jax.random.split(key, 4)
    lim1 = 1.0 / jnp.sqrt(jnp.asarray(input_size, dtype))
    lim2 = 1.0 / jnp.sqrt(jnp.asarray(hidden_size, dtype))
    w1 = jax.random.uniform(k1, (input_size, hidden_size), dtype, -lim1, lim1)
    b1 = jax.random.uniform(k2, (hidden_size,), dtype, -lim1, lim1)
    w2 = jax.random.uniform(k3, (hidden_size, num_classes), dtype, -lim2, lim2)
    b2 = jax.random.uniform(k4, (num_classes,), dtype, -lim2, lim2)
    return w1, b1, w2, b2


if __name__ == "__main__":
    # Small shapes consistent with the PyTorch module (hidden=50, classes=4).
    input_size = 16
    hidden_size = 50
    num_classes = 4
    batch = 8

    key = jax.random.PRNGKey(0)
    kx, kp = jax.random.split(key)
    x = jax.random.normal(kx, (batch, input_size), jnp.float32)
    w1, b1, w2, b2 = init_params(kp, input_size, hidden_size, num_classes)

    # Pad (and bf16-cast) the params once, outside the per-call hot path.
    padded_params = prepare_params(w1, b1, w2, b2)

    out = simple_net_forward(x, padded_params, num_classes)
    out = jax.block_until_ready(out)

    # Pure-JAX f32 reference.  The kernel uses bf16 MXU operands with f32
    # accumulation, so compare at bf16-level tolerance.
    ref = jnp.maximum(x @ w1 + b1, 0.0) @ w2 + b2
    assert out.shape == (batch, num_classes)
    assert jnp.allclose(out, ref, atol=3e-2, rtol=3e-2), (out, ref)

    print("KERNEL_OK")
</pallas_src>

<mosaic_0001>
module attributes {stable_mosaic.version = 11 : i64} {
  func.func @mlp_kernel(%arg0: i32, %arg1: memref<8x16xf32, #tpu.memory_space<vmem>>, %arg2: memref<16x128xbf16, #tpu.memory_space<vmem>>, %arg3: memref<1x128xf32, #tpu.memory_space<vmem>>, %arg4: memref<128x128xbf16, #tpu.memory_space<vmem>>, %arg5: memref<1x128xf32, #tpu.memory_space<vmem>>, %arg6: memref<8x128xf32, #tpu.memory_space<vmem>>) attributes {dimension_semantics = [#tpu.dimension_semantics<parallel>], iteration_bounds = array<i64: 1>, scalar_prefetch = 0 : i64, scratch_operands = 0 : i64, tpu.core_type = #tpu.core_type<tc>, window_params = [{transform_indices = @transform_0, window_bounds = array<i64: 8, 16>}, {pipeline_mode = #tpu.pipeline_mode<synchronous>, transform_indices = @transform_1, window_bounds = array<i64: 16, 128>}, {pipeline_mode = #tpu.pipeline_mode<synchronous>, transform_indices = @transform_2, window_bounds = array<i64: 1, 128>}, {pipeline_mode = #tpu.pipeline_mode<synchronous>, transform_indices = @transform_3, window_bounds = array<i64: 128, 128>}, {pipeline_mode = #tpu.pipeline_mode<synchronous>, transform_indices = @transform_4, window_bounds = array<i64: 1, 128>}, {transform_indices = @transform_5, window_bounds = array<i64: 8, 128>}]} {
    %c0 = arith.constant 0 : index
    %c0_0 = arith.constant 0 : index
    %0 = vector.load %arg1[%c0, %c0_0] : memref<8x16xf32, #tpu.memory_space<vmem>>, vector<8x16xf32>
    %1 = arith.truncf %0 : vector<8x16xf32> to vector<8x16xbf16>
    %c0_1 = arith.constant 0 : index
    %c0_2 = arith.constant 0 : index
    %2 = vector.load %arg2[%c0_1, %c0_2] : memref<16x128xbf16, #tpu.memory_space<vmem>>, vector<16x128xbf16>
    %cst = arith.constant dense<0.000000e+00> : vector<8x128xf32>
    %3 = tpu.matmul %1, %2, %cst {dimension_numbers = #tpu.dot_dimension_numbers<[1], [0], [0], [1], [0, 0, 1, 1], [], []>} : vector<8x16xbf16>, vector<16x128xbf16>, vector<8x128xf32> -> vector<8x128xf32>
    %c0_3 = arith.constant 0 : index
    %c0_4 = arith.constant 0 : index
    %4 = vector.load %arg3[%c0_3, %c0_4] : memref<1x128xf32, #tpu.memory_space<vmem>>, vector<1x128xf32>
    %5 = vector.broadcast %4 : vector<1x128xf32> to vector<8x128xf32>
    %6 = arith.addf %3, %5 : vector<8x128xf32>
    %cst_5 = arith.constant 0.000000e+00 : f32
    %7 = vector.broadcast %cst_5 : f32 to vector<8x128xf32>
    %8 = arith.maximumf %6, %7 : vector<8x128xf32>
    %9 = arith.truncf %8 : vector<8x128xf32> to vector<8x128xbf16>
    %c0_6 = arith.constant 0 : index
    %c0_7 = arith.constant 0 : index
    %10 = vector.load %arg4[%c0_6, %c0_7] : memref<128x128xbf16, #tpu.memory_space<vmem>>, vector<128x128xbf16>
    %cst_8 = arith.constant dense<0.000000e+00> : vector<8x128xf32>
    %11 = tpu.matmul %9, %10, %cst_8 {dimension_numbers = #tpu.dot_dimension_numbers<[1], [0], [0], [1], [0, 0, 1, 1], [], []>} : vector<8x128xbf16>, vector<128x128xbf16>, vector<8x128xf32> -> vector<8x128xf32>
    %c0_9 = arith.constant 0 : index
    %c0_10 = arith.constant 0 : index
    %12 = vector.load %arg5[%c0_9, %c0_10] : memref<1x128xf32, #tpu.memory_space<vmem>>, vector<1x128xf32>
    %13 = vector.broadcast %12 : vector<1x128xf32> to vector<8x128xf32>
    %14 = arith.addf %11, %13 : vector<8x128xf32>
    %c0_11 = arith.constant 0 : index
    %c0_12 = arith.constant 0 : index
    %15 = vector.load %arg6[%c0_11, %c0_12] : memref<8x128xf32, #tpu.memory_space<vmem>>, vector<8x128xf32>
    tpu.vector_store %arg6[%c0_11, %c0_12], %14 {strides = array<i32>} : memref<8x128xf32, #tpu.memory_space<vmem>>, vector<8x128xf32>,
    return
  }
  func.func @transform_0(%arg0: i32) -> (i32, i32) {
    %c0_i32 = arith.constant 0 : i32
    %c0_i32_0 = arith.constant 0 : i32
    return %arg0, %c0_i32 : i32, i32
  }
  func.func @transform_1(%arg0: i32) -> (i32, i32) {
    %c0_i32 = arith.constant 0 : i32
    %c0_i32_0 = arith.constant 0 : i32
    %c0_i32_1 = arith.constant 0 : i32
    return %c0_i32, %c0_i32_0 : i32, i32
  }
  func.func @transform_2(%arg0: i32) -> (i32, i32) {
    %c0_i32 = arith.constant 0 : i32
    %c0_i32_0 = arith.constant 0 : i32
    %c0_i32_1 = arith.constant 0 : i32
    return %c0_i32, %c0_i32_0 : i32, i32
  }
  func.func @transform_3(%arg0: i32) -> (i32, i32) {
    %c0_i32 = arith.constant 0 : i32
    %c0_i32_0 = arith.constant 0 : i32
    %c0_i32_1 = arith.constant 0 : i32
    return %c0_i32, %c0_i32_0 : i32, i32
  }
  func.func @transform_4(%arg0: i32) -> (i32, i32) {
    %c0_i32 = arith.constant 0 : i32
    %c0_i32_0 = arith.constant 0 : i32
    %c0_i32_1 = arith.constant 0 : i32
    return %c0_i32, %c0_i32_0 : i32, i32
  }
  func.func @transform_5(%arg0: i32) -> (i32, i32) {
    %c0_i32 = arith.constant 0 : i32
    %c0_i32_0 = arith.constant 0 : i32
    return %arg0, %c0_i32 : i32, i32
  }
}

module attributes {stable_mosaic.version = 11 : i64} {
  func.func @mlp_kernel(%arg0: i32, %arg1: memref<8x16xf32, #tpu.memory_space<vmem>>, %arg2: memref<16x128xbf16, #tpu.memory_space<vmem>>, %arg3: memref<1x128xf32, #tpu.memory_space<vmem>>, %arg4: memref<128x128xbf16, #tpu.memory_space<vmem>>, %arg5: memref<1x128xf32, #tpu.memory_space<vmem>>, %arg6: memref<8x128xf32, #tpu.memory_space<vmem>>) attributes {dimension_semantics = [#tpu.dimension_semantics<parallel>], iteration_bounds = array<i64: 1>, scalar_prefetch = 0 : i64, scratch_operands = 0 : i64, tpu.core_type = #tpu.core_type<tc>, window_params = [{transform_indices = @transform_0, window_bounds = array<i64: 8, 16>}, {pipeline_mode = #tpu.pipeline_mode<synchronous>, transform_indices = @transform_1, window_bounds = array<i64: 16, 128>}, {pipeline_mode = #tpu.pipeline_mode<synchronous>, transform_indices = @transform_2, window_bounds = array<i64: 1, 128>}, {pipeline_mode = #tpu.pipeline_mode<synchronous>, transform_indices = @transform_3, window_bounds = array<i64: 128, 128>}, {pipeline_mode = #tpu.pipeline_mode<synchronous>, transform_indices = @transform_4, window_bounds = array<i64: 1, 128>}, {transform_indices = @transform_5, window_bounds = array<i64: 8, 128>}]} {
    %c0 = arith.constant 0 : index
    %c0_0 = arith.constant 0 : index
    %0 = vector.load %arg1[%c0, %c0_0] : memref<8x16xf32, #tpu.memory_space<vmem>>, vector<8x16xf32>
    %1 = arith.truncf %0 : vector<8x16xf32> to vector<8x16xbf16>
    %c0_1 = arith.constant 0 : index
    %c0_2 = arith.constant 0 : index
    %2 = vector.load %arg2[%c0_1, %c0_2] : memref<16x128xbf16, #tpu.memory_space<vmem>>, vector<16x128xbf16>
    %cst = arith.constant dense<0.000000e+00> : vector<8x128xf32>
    %3 = tpu.matmul %1, %2, %cst {dimension_numbers = #tpu.dot_dimension_numbers<[1], [0], [0], [1], [0, 0, 1, 1], [], []>} : vector<8x16xbf16>, vector<16x128xbf16>, vector<8x128xf32> -> vector<8x128xf32>
    %c0_3 = arith.constant 0 : index
    %c0_4 = arith.constant 0 : index
    %4 = vector.load %arg3[%c0_3, %c0_4] : memref<1x128xf32, #tpu.memory_space<vmem>>, vector<1x128xf32>
    %5 = vector.broadcast %4 : vector<1x128xf32> to vector<8x128xf32>
    %6 = arith.addf %3, %5 : vector<8x128xf32>
    %cst_5 = arith.constant 0.000000e+00 : f32
    %7 = vector.broadcast %cst_5 : f32 to vector<8x128xf32>
    %8 = arith.maximumf %6, %7 : vector<8x128xf32>
    %9 = arith.truncf %8 : vector<8x128xf32> to vector<8x128xbf16>
    %c0_6 = arith.constant 0 : index
    %c0_7 = arith.constant 0 : index
    %10 = vector.load %arg4[%c0_6, %c0_7] : memref<128x128xbf16, #tpu.memory_space<vmem>>, vector<128x128xbf16>
    %cst_8 = arith.constant dense<0.000000e+00> : vector<8x128xf32>
    %11 = tpu.matmul %9, %10, %cst_8 {dimension_numbers = #tpu.dot_dimension_numbers<[1], [0], [0], [1], [0, 0, 1, 1], [], []>} : vector<8x128xbf16>, vector<128x128xbf16>, vector<8x128xf32> -> vector<8x128xf32>
    %c0_9 = arith.constant 0 : index
    %c0_10 = arith.constant 0 : index
    %12 = vector.load %arg5[%c0_9, %c0_10] : memref<1x128xf32, #tpu.memory_space<vmem>>, vector<1x128xf32>
    %13 = vector.broadcast %12 : vector<1x128xf32> to vector<8x128xf32>
    %14 = arith.addf %11, %13 : vector<8x128xf32>
    %c0_11 = arith.constant 0 : index
    %c0_12 = arith.constant 0 : index
    %15 = vector.load %arg6[%c0_11, %c0_12] : memref<8x128xf32, #tpu.memory_space<vmem>>, vector<8x128xf32>
    tpu.vector_store %arg6[%c0_11, %c0_12], %14 {strides = array<i32>} : memref<8x128xf32, #tpu.memory_space<vmem>>, vector<8x128xf32>,
    return
  }
  func.func @transform_0(%arg0: i32) -> (i32, i32) {
    %c0_i32 = arith.constant 0 : i32
    %c0_i32_0 = arith.constant 0 : i32
    return %arg0, %c0_i32 : i32, i32
  }
  func.func @transform_1(%arg0: i32) -> (i32, i32) {
    %c0_i32 = arith.constant 0 : i32
    %c0_i32_0 = arith.constant 0 : i32
    %c0_i32_1 = arith.constant 0 : i32
    return %c0_i32, %c0_i32_0 : i32, i32
  }
  func.func @transform_2(%arg0: i32) -> (i32, i32) {
    %c0_i32 = arith.constant 0 : i32
    %c0_i32_0 = arith.constant 0 : i32
    %c0_i32_1 = arith.constant 0 : i32
    return %c0_i32, %c0_i32_0 : i32, i32
  }
  func.func @transform_3(%arg0: i32) -> (i32, i32) {
    %c0_i32 = arith.constant 0 : i32
    %c0_i32_0 = arith.constant 0 : i32
    %c0_i32_1 = arith.constant 0 : i32
    return %c0_i32, %c0_i32_0 : i32, i32
  }
  func.func @transform_4(%arg0: i32) -> (i32, i32) {
    %c0_i32 = arith.constant 0 : i32
    %c0_i32_0 = arith.constant 0 : i32
    %c0_i32_1 = arith.constant 0 : i32
    return %c0_i32, %c0_i32_0 : i32, i32
  }
  func.func @transform_5(%arg0: i32) -> (i32, i32) {
    %c0_i32 = arith.constant 0 : i32
    %c0_i32_0 = arith.constant 0 : i32
    return %arg0, %c0_i32 : i32, i32
  }
}

</mosaic_0001>

<bundles_post_ra>
// kernel: _forward_padded.1
= control target key start
LH: loop header
LB: loop body
LE: loop exit
PB: predicated region body
PF: predicated region fallthrough
CT: control target
= control target key end

     0   :  { %10 = vsyncpa [#allocation3], 0  ;;  %s425_s0 = inlined_call_operand.hbm [shape: f32[8,16], index: 0, kind: input, shape index: {}]   ;;  %s426_s1 = inlined_call_operand.hbm [shape: bf16[16,128], index: 1, kind: input, shape index: {}]   ;;  %s427_s2 = inlined_call_operand.vmem [shape: f32[1,128], index: 2, kind: input, shape index: {}]   ;;  %s428_s3 = inlined_call_operand.hbm [shape: bf16[128,128], index: 3, kind: input, shape index: {}]   ;;  %s429_s4 = inlined_call_operand.vmem [shape: f32[1,128], index: 4, kind: input, shape index: {}]   ;;  %s430_s5 = inlined_call_operand.vmem [shape: f32[8,128], index: 5, kind: output, shape index: {}]  }
   0x1   :  { %11 = vsyncpa [#allocation5], 0  ;;  %s370_s18 = smov [#allocation4]  }
   0x2   :  { %s27_s19 = sshll.u32 %s370_s18, 4  ;;  %s28_s19 = int_to_ptr.vmem [resolvable:$true] %s27_s19 }
   0x3   :  { %s314_s20 = scalar_lea.vmem %s28_s19, 128  ;;  %p319_p1 = scmp.lt.s32.totalorder %s28_s19, %s28_s19 }
   0x4   :  { %p315_p0 = scmp.ne.s32.totalorder %s28_s19, %s314_s20  ;;  %p320_p2 = scmp.lt.s32.totalorder %s314_s20, %s314_s20 }
   0x6   :  { %p321_p3 = por %p320_p2, %p319_p1 }
   0x8   :  { %p322_p4 = pnand %p321_p3, %p315_p0 }
   0xa   :  { %325 = shalt.err (!%p322_p4)
}
   0xb   :  { %s371_s21 = smov 64   ;;  %s372_s22 = smov 4  }
   0xc   :  { %33 = dma.hbm_to_vmem [thread:$0]  %s426_s1, 128, %s28_s19, [#allocation5], %s371_s21, %s371_s21, %s372_s22  }
   0xd   :  { %s373_s25 = smov [#allocation2]   ;;  %s374_s27 = smov [#allocation6]  }
   0xe   :  { %s18_s26 = sshll.u32 %s373_s25, 4  ;;  %s41_s28 = sshll.u32 %s374_s27, 4  ;;  %s19_s26 = int_to_ptr.vmem [resolvable:$true] %s18_s26  ;;  %s42_s28 = int_to_ptr.vmem [resolvable:$true] %s41_s28 }
   0xf   :  { %s334_s29 = scalar_lea.vmem %s19_s26, 128  ;;  %p339_p6 = scmp.lt.s32.totalorder %s19_s26, %s19_s26 }
  0x10   :  { %p335_p5 = scmp.ne.s32.totalorder %s19_s26, %s334_s29  ;;  %p340_p7 = scmp.lt.s32.totalorder %s334_s29, %s334_s29 }
  0x12   :  { %p341_p8 = por %p340_p7, %p339_p6 }
  0x14   :  { %p342_p9 = pnand %p341_p8, %p335_p5 }
  0x16   :  { %345 = shalt.err (!%p342_p9)
}
  0x17   :  { %21 = dma.hbm_to_vmem [thread:$0]  %s425_s0, 128, %s19_s26, [#allocation3]  }
  0x18   :  { %s354_s7 = scalar_lea.vmem %s42_s28, 1024  ;;  %p359_p11 = scmp.lt.s32.totalorder %s42_s28, %s42_s28 }
  0x19   :  { %p355_p10 = scmp.ne.s32.totalorder %s42_s28, %s354_s7  ;;  %p360_p12 = scmp.lt.s32.totalorder %s354_s7, %s354_s7 }
  0x1b   :  { %p361_p13 = por %p360_p12, %p359_p11 }
  0x1d   :  { %p362_p0 = pnand %p361_p13, %p355_p10 }
  0x1f   :  { %365 = shalt.err (!%p362_p0)
}
  0x20   :  { %47 = dma.hbm_to_vmem [thread:$0]  %s428_s3, 1024, %s42_s28, [#allocation5], %s371_s21, %s371_s21, %s372_s22  }
  0x21   :  { %366 = dma.done.wait [#allocation3], 128  }
  0x22   :  { %367 = vsyncadd [#allocation3], 4294967168 }
  0x23   :  { %368 = dma.done.wait [#allocation5], 1152  }
  0x24   :  { %369 = vsyncadd [#allocation5], 4294966144  ;;  %v375_v0 = vmov 0.0   ;;  %vm376_vm0 = vmmov 0   ;;  %v297_v1 = vld [vmem:[#allocation4] sm:$0xff]   ;;  %v60_v2 = vld [vmem:[#allocation2] sm:$0xff] }
  0x25   :  { %264 = vmatprep.subr.bf16.mxu0 %v375_v0  ;;  %266 = vmatprep.mubr.msk.bf16.mxu0 %vm376_vm0, %v375_v0  ;;  %v61_v3 = vpack.c.bf16 %v60_v2, %v60_v2  ;;  %vm77_vm1 = vcmask 130048   ;;  %v298_v4 = vld [vmem:[#allocation6 + $0x38] sm:$0xff]   ;;  %v299_v5 = vld [vmem:[#allocation6 + $0x30] sm:$0xff]   ;;  %v300_v6 = vld [vmem:[#allocation6 + $0x28] sm:$0xff]  }
  0x26   :  { %270 = vmatprep.subr.bf16.mxu1 %v375_v0  ;;  %286 = vmatprep.mubr.msk.bf16.mxu1 %vm376_vm0, %v375_v0  ;;  %v301_v7 = vld [vmem:[#allocation6 + $0x20] sm:$0xff]   ;;  %v302_v8 = vld [vmem:[#allocation6 + $0x18] sm:$0xff]   ;;  %v303_v9 = vld [vmem:[#allocation6 + $0x10] sm:$0xff]  }
  0x27   :  { %265 = vmatpush3.bf16.msra.mxu0 %v297_v1  ;;  %271 = vmatpush3.bf16.msra.mxu1 %v298_v4  ;;  %v304_v10 = vld [vmem:[#allocation6 + $0x8] sm:$0xff]   ;;  %v305_v11 = vld [vmem:[#allocation6] sm:$0xff]   ;;  %v241_v12 = vld [vmem:[%s427_s2] ss:$0 sm:$0xff] }
  0x28   :  { %272 = vmatprep.subr.bf16.mxu1 %v375_v0  ;;  %v244_v20 = vld [vmem:[%s429_s4] ss:$0 sm:$0xff] }
  0x2a   :  { %267 = vmatmul.mubr.msk.bf16.vlgmr.msra.gmra.mxu0 %vm77_vm1, %v61_v3 }
  0x2b   :  { %273 = vmatpush3.bf16.msra.mxu1 %v299_v5 }
  0x2c   :  { %274 = vmatprep.subr.bf16.mxu1 %v375_v0 }
  0x2f   :  { %275 = vmatpush3.bf16.msra.mxu1 %v300_v6 }
  0x30   :  { %276 = vmatprep.subr.bf16.mxu1 %v375_v0 }
  0x33   :  { %277 = vmatpush3.bf16.msra.mxu1 %v301_v7 }
  0x34   :  { %278 = vmatprep.subr.bf16.mxu1 %v375_v0 }
  0x37   :  { %279 = vmatpush3.bf16.msra.mxu1 %v302_v8 }
  0x38   :  { %280 = vmatprep.subr.bf16.mxu1 %v375_v0 }
  0x3b   :  { %281 = vmatpush3.bf16.msra.mxu1 %v303_v9 }
  0x3c   :  { %282 = vmatprep.subr.bf16.mxu1 %v375_v0 }
  0x3f   :  { %283 = vmatpush3.bf16.msra.mxu1 %v304_v10 }
  0x40   :  { %284 = vmatprep.subr.bf16.mxu1 %v375_v0 }
  0x43   :  { %285 = vmatpush3.bf16.msra.mxu1 %v305_v11 }
  0xea   :  { %v115_v13 = vpop.f32.mrf.mxu0 }
  0xeb   :  { %v116_v14 = vadd.f32 %v241_v12, %v115_v13 }
  0xec   :  { %v268_v15 = vpop.f32.mrf.mxu0 }
  0xed   :  { %v121_v16 = vmax.f32 %v116_v14, 0.0 }
  0xee   :  { %v118_v17 = vpop.f32.mrf.mxu0 }
  0xef   :  { %v122_v18 = vpack.c.bf16 %v121_v16, %v121_v16 }
  0xf0   :  { %v269_v19 = vpop.f32.mrf.mxu0 }
  0xf1   :  { %287 = vmatmul.mubr.bf16.vlgmr.msra.gmra.mxu1 %v122_v18 }
 0x1b1   :  { %v228_v21 = vpop.f32.mrf.mxu1 }
 0x1b2   :  { %v229_v22 = vadd.f32 %v244_v20, %v228_v21 }
 0x1b3   :  { %v288_v23 = vpop.f32.mrf.mxu1 }
 0x1b4   :  { %234 = vst [vmem:[%s430_s5] sm:$0xff] %v229_v22 }
 0x1b5   :  { %v231_v24 = vpop.f32.mrf.mxu1 }
 0x1b7   :  { %v289_v25 = vpop.f32.mrf.mxu1 }
 0x1b8   :  { %239 = vsyncpa [#allocation3], 1 }
 0x1b9   :  { %240 = vsyncpa [#allocation5], 1 }

// kernel: _forward_padded.1
= control target key start
LH: loop header
LB: loop body
LE: loop exit
PB: predicated region body
PF: predicated region fallthrough
CT: control target
= control target key end

     0   :  { %10 = vsyncpa [#allocation3], 0  ;;  %s425_s0 = inlined_call_operand.hbm [shape: f32[8,16], index: 0, kind: input, shape index: {}]   ;;  %s426_s1 = inlined_call_operand.hbm [shape: bf16[16,128], index: 1, kind: input, shape index: {}]   ;;  %s427_s2 = inlined_call_operand.vmem [shape: f32[1,128], index: 2, kind: input, shape index: {}]   ;;  %s428_s3 = inlined_call_operand.hbm [shape: bf16[128,128], index: 3, kind: input, shape index: {}]   ;;  %s429_s4 = inlined_call_operand.vmem [shape: f32[1,128], index: 4, kind: input, shape index: {}]   ;;  %s430_s5 = inlined_call_operand.vmem [shape: f32[8,128], index: 5, kind: output, shape index: {}]  }
   0x1   :  { %11 = vsyncpa [#allocation5], 0  ;;  %s370_s18 = smov [#allocation4]  }
   0x2   :  { %s27_s19 = sshll.u32 %s370_s18, 4  ;;  %s28_s19 = int_to_ptr.vmem [resolvable:$true] %s27_s19 }
   0x3   :  { %s314_s20 = scalar_lea.vmem %s28_s19, 128  ;;  %p319_p1 = scmp.lt.s32.totalorder %s28_s19, %s28_s19 }
   0x4   :  { %p315_p0 = scmp.ne.s32.totalorder %s28_s19, %s314_s20  ;;  %p320_p2 = scmp.lt.s32.totalorder %s314_s20, %s314_s20 }
   0x6   :  { %p321_p3 = por %p320_p2, %p319_p1 }
   0x8   :  { %p322_p4 = pnand %p321_p3, %p315_p0 }
   0xa   :  { %325 = shalt.err (!%p322_p4)
}
   0xb   :  { %s371_s21 = smov 64   ;;  %s372_s22 = smov 4  }
   0xc   :  { %33 = dma.hbm_to_vmem [thread:$0]  %s426_s1, 128, %s28_s19, [#allocation5], %s371_s21, %s371_s21, %s372_s22  }
   0xd   :  { %s373_s25 = smov [#allocation2]   ;;  %s374_s27 = smov [#allocation6]  }
   0xe   :  { %s18_s26 = sshll.u32 %s373_s25, 4  ;;  %s41_s28 = sshll.u32 %s374_s27, 4  ;;  %s19_s26 = int_to_ptr.vmem [resolvable:$true] %s18_s26  ;;  %s42_s28 = int_to_ptr.vmem [resolvable:$true] %s41_s28 }
   0xf   :  { %s334_s29 = scalar_lea.vmem %s19_s26, 128  ;;  %p339_p6 = scmp.lt.s32.totalorder %s19_s26, %s19_s26 }
  0x10   :  { %p335_p5 = scmp.ne.s32.totalorder %s19_s26, %s334_s29  ;;  %p340_p7 = scmp.lt.s32.totalorder %s334_s29, %s334_s29 }
  0x12   :  { %p341_p8 = por %p340_p7, %p339_p6 }
  0x14   :  { %p342_p9 = pnand %p341_p8, %p335_p5 }
  0x16   :  { %345 = shalt.err (!%p342_p9)
}
  0x17   :  { %21 = dma.hbm_to_vmem [thread:$0]  %s425_s0, 128, %s19_s26, [#allocation3]  }
  0x18   :  { %s354_s7 = scalar_lea.vmem %s42_s28, 1024  ;;  %p359_p11 = scmp.lt.s32.totalorder %s42_s28, %s42_s28 }
  0x19   :  { %p355_p10 = scmp.ne.s32.totalorder %s42_s28, %s354_s7  ;;  %p360_p12 = scmp.lt.s32.totalorder %s354_s7, %s354_s7 }
  0x1b   :  { %p361_p13 = por %p360_p12, %p359_p11 }
  0x1d   :  { %p362_p0 = pnand %p361_p13, %p355_p10 }
  0x1f   :  { %365 = shalt.err (!%p362_p0)
}
  0x20   :  { %47 = dma.hbm_to_vmem [thread:$0]  %s428_s3, 1024, %s42_s28, [#allocation5], %s371_s21, %s371_s21, %s372_s22  }
  0x21   :  { %366 = dma.done.wait [#allocation3], 128  }
  0x22   :  { %367 = vsyncadd [#allocation3], 4294967168 }
  0x23   :  { %368 = dma.done.wait [#allocation5], 1152  }
  0x24   :  { %369 = vsyncadd [#allocation5], 4294966144  ;;  %v375_v0 = vmov 0.0   ;;  %vm376_vm0 = vmmov 0   ;;  %v297_v1 = vld [vmem:[#allocation4] sm:$0xff]   ;;  %v60_v2 = vld [vmem:[#allocation2] sm:$0xff] }
  0x25   :  { %264 = vmatprep.subr.bf16.mxu0 %v375_v0  ;;  %266 = vmatprep.mubr.msk.bf16.mxu0 %vm376_vm0, %v375_v0  ;;  %v61_v3 = vpack.c.bf16 %v60_v2, %v60_v2  ;;  %vm77_vm1 = vcmask 130048   ;;  %v298_v4 = vld [vmem:[#allocation6 + $0x38] sm:$0xff]   ;;  %v299_v5 = vld [vmem:[#allocation6 + $0x30] sm:$0xff]   ;;  %v300_v6 = vld [vmem:[#allocation6 + $0x28] sm:$0xff]  }
  0x26   :  { %270 = vmatprep.subr.bf16.mxu1 %v375_v0  ;;  %286 = vmatprep.mubr.msk.bf16.mxu1 %vm376_vm0, %v375_v0  ;;  %v301_v7 = vld [vmem:[#allocation6 + $0x20] sm:$0xff]   ;;  %v302_v8 = vld [vmem:[#allocation6 + $0x18] sm:$0xff]   ;;  %v303_v9 = vld [vmem:[#allocation6 + $0x10] sm:$0xff]  }
  0x27   :  { %265 = vmatpush3.bf16.msra.mxu0 %v297_v1  ;;  %271 = vmatpush3.bf16.msra.mxu1 %v298_v4  ;;  %v304_v10 = vld [vmem:[#allocation6 + $0x8] sm:$0xff]   ;;  %v305_v11 = vld [vmem:[#allocation6] sm:$0xff]   ;;  %v241_v12 = vld [vmem:[%s427_s2] ss:$0 sm:$0xff] }
  0x28   :  { %272 = vmatprep.subr.bf16.mxu1 %v375_v0  ;;  %v244_v20 = vld [vmem:[%s429_s4] ss:$0 sm:$0xff] }
  0x2a   :  { %267 = vmatmul.mubr.msk.bf16.vlgmr.msra.gmra.mxu0 %vm77_vm1, %v61_v3 }
  0x2b   :  { %273 = vmatpush3.bf16.msra.mxu1 %v299_v5 }
  0x2c   :  { %274 = vmatprep.subr.bf16.mxu1 %v375_v0 }
  0x2f   :  { %275 = vmatpush3.bf16.msra.mxu1 %v300_v6 }
  0x30   :  { %276 = vmatprep.subr.bf16.mxu1 %v375_v0 }
  0x33   :  { %277 = vmatpush3.bf16.msra.mxu1 %v301_v7 }
  0x34   :  { %278 = vmatprep.subr.bf16.mxu1 %v375_v0 }
  0x37   :  { %279 = vmatpush3.bf16.msra.mxu1 %v302_v8 }
  0x38   :  { %280 = vmatprep.subr.bf16.mxu1 %v375_v0 }
  0x3b   :  { %281 = vmatpush3.bf16.msra.mxu1 %v303_v9 }
  0x3c   :  { %282 = vmatprep.subr.bf16.mxu1 %v375_v0 }
  0x3f   :  { %283 = vmatpush3.bf16.msra.mxu1 %v304_v10 }
  0x40   :  { %284 = vmatprep.subr.bf16.mxu1 %v375_v0 }
  0x43   :  { %285 = vmatpush3.bf16.msra.mxu1 %v305_v11 }
  0xea   :  { %v115_v13 = vpop.f32.mrf.mxu0 }
  0xeb   :  { %v116_v14 = vadd.f32 %v241_v12, %v115_v13 }
  0xec   :  { %v268_v15 = vpop.f32.mrf.mxu0 }
  0xed   :  { %v121_v16 = vmax.f32 %v116_v14, 0.0 }
  0xee   :  { %v118_v17 = vpop.f32.mrf.mxu0 }
  0xef   :  { %v122_v18 = vpack.c.bf16 %v121_v16, %v121_v16 }
  0xf0   :  { %v269_v19 = vpop.f32.mrf.mxu0 }
  0xf1   :  { %287 = vmatmul.mubr.bf16.vlgmr.msra.gmra.mxu1 %v122_v18 }
 0x1b1   :  { %v228_v21 = vpop.f32.mrf.mxu1 }
 0x1b2   :  { %v229_v22 = vadd.f32 %v244_v20, %v228_v21 }
 0x1b3   :  { %v288_v23 = vpop.f32.mrf.mxu1 }
 0x1b4   :  { %234 = vst [vmem:[%s430_s5] sm:$0xff] %v229_v22 }
 0x1b5   :  { %v231_v24 = vpop.f32.mrf.mxu1 }
 0x1b7   :  { %v289_v25 = vpop.f32.mrf.mxu1 }
 0x1b8   :  { %239 = vsyncpa [#allocation3], 1 }
 0x1b9   :  { %240 = vsyncpa [#allocation5], 1 }

</bundles_post_ra>
